<compile_context>
chip_gen: v7x
topology: tpu7x:2x2x1
jax: 0.10.0
libtpu: 0.0.40
codegen_flags: <defaults>
</compile_context>

<pallas_src>
import functools

import numpy as np
import jax
import jax.numpy as jnp
from jax.experimental import pallas as pl
from jax.experimental.pallas import tpu as pltpu

N_FEATS = 8
HIDDEN = 32
PACK_ROWS = 16  # W_state_eff (8) + bias_eff (1) + zero pad (7): keeps sublane tiles full


def policy_fc_kernel(state_ref, wb_ref, o_ref):
    # Collapsed fc block: y = relu(state @ W_state_eff + bias_eff)
    # (action-embedding contribution and both Linear biases are pre-folded into
    #  bias_eff; the outer F.relu of forward() is idempotent over the inner ReLU).
    w = wb_ref[0:N_FEATS, :]                    # (8, 32)  effective state weights
    b = wb_ref[N_FEATS:N_FEATS + 1, :]          # (1, 32)  effective bias
    y = jnp.dot(state_ref[...], w, preferred_element_type=jnp.float32) + b
    o_ref[...] = jnp.maximum(y, 0.0)


def _action_embedding(actions):
    """Trace-time (numpy) construction of the (1, n_feats) action embedding."""
    a0 = actions[0]
    emb = np.zeros((1, N_FEATS), np.float32)
    if len(a0) > 1:
        for k in a0:
            emb[0, int(k)] = 1.0
        emb /= float(len(a0) - 1)   # matches the PyTorch /(len(actions[0]) - 1)
    return jnp.asarray(emb)         # constant folded into the jitted program


@functools.partial(jax.jit, static_argnums=0)
def policy_forward(actions, state, params):
    """Pallas implementation of Policy.forward for cat_feats=[].

    `actions` is a hashable tuple-of-tuples (static jit arg); changing its contents
    re-traces, mirroring the data-dependent Python branch in the module.
    # TODO(synk): if this backs act() scoring of many candidate action sets, build a
    # batched (N_cand, 8) action-embedding input instead of re-tracing per tuple.
    """
    action_emb = _action_embedding(actions)                       # (1, 8) constant
    # Fold the constant action-embedding contribution into the effective bias
    # (tiny (1,8)x(8,32) op that fuses into the surrounding XLA program).
    bias_eff = action_emb @ params["w_emb_eff"] + params["b_eff"]  # (1, 32)
    # Pack [W_state_eff ; bias_eff ; zero pad] into one operand -> 2 input DMAs.
    wb = jnp.concatenate(
        [params["w_state_eff"], bias_eff,
         jnp.zeros((PACK_ROWS - N_FEATS - 1, HIDDEN), jnp.float32)],
        axis=0)                                                    # (16, 32)

    B = state.shape[0]
    vmem = pl.BlockSpec(memory_space=pltpu.MemorySpace.VMEM)
    cost = pl.CostEstimate(
        flops=2 * B * N_FEATS * HIDDEN + 2 * B * HIDDEN,
        transcendentals=0,
        bytes_accessed=4 * (B * N_FEATS + PACK_ROWS * HIDDEN + B * HIDDEN),
    )
    return pl.pallas_call(
        policy_fc_kernel,
        out_shape=jax.ShapeDtypeStruct((B, HIDDEN), jnp.float32),
        in_specs=[vmem, vmem],
        out_specs=vmem,
        cost_estimate=cost,
    )(state.astype(jnp.float32), wb)


def init_params(key):
    # PyTorch nn.Linear default init: U(-1/sqrt(fan_in), +1/sqrt(fan_in)).
    din = 2 * N_FEATS  # emb_size (=n_feats) + len(num_feats) (=n_feats)
    k1, k2, k3, k4 = jax.random.split(key, 4)
    bnd1 = 1.0 / jnp.sqrt(float(din))
    w1 = jax.random.uniform(k1, (HIDDEN, din), jnp.float32, -bnd1, bnd1)   # torch (out,in)
    b1 = jax.random.uniform(k2, (HIDDEN,), jnp.float32, -bnd1, bnd1)
    bnd2 = 1.0 / jnp.sqrt(float(HIDDEN))
    w2 = jax.random.uniform(k3, (HIDDEN, HIDDEN), jnp.float32, -bnd2, bnd2)
    b2 = jax.random.uniform(k4, (HIDDEN,), jnp.float32, -bnd2, bnd2)

    # Collapse the two bias-coupled Linears (no nonlinearity between them) into one
    # effective affine; split its input rows into action-emb half and state half.
    w_eff = w1.T @ w2.T                             # (16, 32)
    b_eff = (b1 @ w2.T + b2).reshape(1, HIDDEN)     # (1, 32)
    params = {
        "w_emb_eff":   w_eff[:N_FEATS, :],   # folded into the bias per call (constant emb)
        "w_state_eff": w_eff[N_FEATS:, :],   # kernel matmul operand (8, 32)
        "b_eff":       b_eff,
    }
    raw = (w1, b1, w2, b2)                   # kept only for the pure-JAX reference check
    return params, raw


def _reference_forward(actions, state, raw):
    # Pure-JAX reference matching the PyTorch semantics (two separate Linears).
    w1, b1, w2, b2 = raw
    a0 = actions[0]
    if len(a0) == 1:
        action_emb = jnp.zeros((1, N_FEATS), jnp.float32)
    else:
        ind = jnp.zeros((N_FEATS,), jnp.float32).at[jnp.asarray(a0)].set(1.0)
        action_emb = (ind / float(len(a0) - 1)).reshape(1, N_FEATS)
    x = jnp.concatenate([action_emb, state], axis=-1)
    h = x @ w1.T + b1
    y = jnp.maximum(h @ w2.T + b2, 0.0)
    return jnp.maximum(y, 0.0)


# TODO(synk): the cat_feats branch (nn.Embedding gathers) and the sampling utilities in
# act()/sample_from_gmm (Categorical / GMM sampling, host RNG) are not part of this
# forward-path kernel (module built with cat_feats=[]).

if __name__ == "__main__":
    key = jax.random.PRNGKey(0)
    pkey, skey = jax.random.split(key)
    params, raw = init_params(pkey)
    params = jax.device_put(params)   # weights stay resident on device

    state = jax.random.normal(skey, (1, N_FEATS), jnp.float32)  # (batch=1, n_feats=8)
    actions = ((0, 2, 5),)            # static, hashable -> no per-call re-trace

    out = policy_forward(actions, state, params)
    out = jax.block_until_ready(out)

    ref = _reference_forward(actions, state, raw)
    assert out.shape == (1, HIDDEN) and out.dtype == jnp.float32
    assert jnp.allclose(out, ref, atol=1e-4, rtol=1e-4), "mismatch vs reference"

    print("KERNEL_OK")
</pallas_src>

<mosaic_0001>
module attributes {stable_mosaic.version = 11 : i64} {
  func.func @policy_fc_kernel(%arg0: memref<1x8xf32, #tpu.memory_space<vmem>>, %arg1: memref<16x32xf32, #tpu.memory_space<vmem>>, %arg2: memref<1x32xf32, #tpu.memory_space<vmem>>) attributes {dimension_semantics = [], scalar_prefetch = 0 : i64, scratch_operands = 0 : i64, tpu.core_type = #tpu.core_type<tc>} {
    %c0 = arith.constant 0 : index
    %c0_0 = arith.constant 0 : index
    %0 = vector.load %arg1[%c0, %c0_0] : memref<16x32xf32, #tpu.memory_space<vmem>>, vector<8x32xf32>
    %c8 = arith.constant 8 : index
    %c0_1 = arith.constant 0 : index
    %1 = vector.load %arg1[%c8, %c0_1] : memref<16x32xf32, #tpu.memory_space<vmem>>, vector<1x32xf32>
    %c0_2 = arith.constant 0 : index
    %c0_3 = arith.constant 0 : index
    %2 = vector.load %arg0[%c0_2, %c0_3] : memref<1x8xf32, #tpu.memory_space<vmem>>, vector<1x8xf32>
    %cst = arith.constant dense<0.000000e+00> : vector<1x32xf32>
    %3 = tpu.matmul %2, %0, %cst {dimension_numbers = #tpu.dot_dimension_numbers<[1], [0], [0], [1], [0, 0, 1, 1], [], []>} : vector<1x8xf32>, vector<8x32xf32>, vector<1x32xf32> -> vector<1x32xf32>
    %4 = arith.addf %3, %1 : vector<1x32xf32>
    %cst_4 = arith.constant 0.000000e+00 : f32
    %5 = vector.broadcast %cst_4 : f32 to vector<1x32xf32>
    %6 = arith.maximumf %4, %5 : vector<1x32xf32>
    %c0_5 = arith.constant 0 : index
    %c0_6 = arith.constant 0 : index
    %7 = vector.load %arg2[%c0_5, %c0_6] : memref<1x32xf32, #tpu.memory_space<vmem>>, vector<1x32xf32>
    tpu.vector_store %arg2[%c0_5, %c0_6], %6 {strides = array<i32>} : memref<1x32xf32, #tpu.memory_space<vmem>>, vector<1x32xf32>,
    return
  }
}

</mosaic_0001>

<bundles_post_ra>
// kernel: policy_forward.1
= control target key start
LH: loop header
LB: loop body
LE: loop exit
PB: predicated region body
PF: predicated region fallthrough
CT: control target
= control target key end

     0   :  { %vm15_vm0 = vcmask 64512   ;;  %v141_v2 = vmov 0.0   ;;  %vm142_vm1 = vmmov 0   ;;  %s180_s0 = inlined_call_operand.vmem [shape: f32[1,8], index: 0, kind: input, shape index: {}]   ;;  %s181_s1 = inlined_call_operand.vmem [shape: f32[16,32], index: 1, kind: input, shape index: {}]   ;;  %s182_s2 = inlined_call_operand.hbm [shape: f32[1,32], index: 2, kind: output, shape index: {}]  }
   0x1   :  { %v12_v0 = vld [vmem:[%s181_s1] sm:$0xff]  ;;  %109 = vmatprep.subr.mxu0 %v141_v2  ;;  %111 = vmatprep.mubr.msk.f32.mxu0 %vm142_vm1, %v141_v2 }
   0x2   :  { %v14_v1 = vld [vmem:[%s180_s0] sm:$0x1] }
   0x3   :  { %7 = vsyncpa [#allocation3], 0  ;;  %110 = vmatpush3.msra.mxu0 %v12_v0  ;;  %v13_v3 = vld [vmem:[%s181_s1 + $0x8] sm:$0x1]  ;;  %s143_s15 = smov [#allocation2]   ;;  %vm90_vm2 = vcmask 253952  }
   0x4   :  { %112 = vmatmul.mubr.msk.f32.vlgmr.msra.gmra.mrb[0].mxu0 %vm15_vm0, %v14_v1  ;;  %s98_s16 = sshll.u32 %s143_s15, 4  ;;  %s99_s16 = int_to_ptr.vmem [resolvable:$true] %s98_s16 }
   0x5   :  { %s117_s0 = scalar_lea.vmem %s99_s16, 16  ;;  %s121_s17 = scalar_lea.vmem %s99_s16, 32 }
   0x6   :  { %p118_p0 = scmp.ne.s32.totalorder %s99_s16, %s117_s0  ;;  %p122_p1 = scmp.lt.s32.totalorder %s99_s16, %s99_s16 }
   0x7   :  { %p123_p2 = scmp.lt.s32.totalorder %s121_s17, %s117_s0 }
   0x9   :  { %p124_p3 = por %p123_p2, %p122_p1 }
   0xb   :  { %p125_p4 = pnand %p124_p3, %p118_p0 }
  0xd7   :  { %v85_v4 = vpop.f32.mrb[0].mxu0 }
  0xd8   :  { %v86_v5 = vadd.f32 %v85_v4, %v13_v3  ;;  %v113_v6 = vpop.f32.mrb[1].mxu0 }
  0xda   :  { %v89_v7 = vmax.f32 %v86_v5, 0.0 }
  0xdc   :  { %91 = vst.msk [vmem:[#allocation2] sm:$0x1] %vm90_vm2, %v89_v7 }
  0xdd   :  { %128 = shalt.err (!%p125_p4)
}
  0xde   :  { %s129_s1 = scalar_lea.hbm %s182_s2, 16 }
  0xdf   :  { %p130_p5 = scmp.ne.s32.totalorder %s182_s2, %s129_s1  ;;  %p133_p6 = scmp.lt.u32.totalorder %s129_s1, %s182_s2 }
  0xe1   :  { %p135_p7 = pnand %p133_p6, %p130_p5 }
  0xe3   :  { %138 = shalt.err (!%p135_p7)
}
  0xe4   :  { %101 = dma.vmem_to_hbm [thread:$0]  %s99_s16, 16, %s182_s2, [#allocation3]  }
  0xe5   :  { %139 = dma.done.wait [#allocation3], 16  }
  0xe6   :  { %140 = vsyncadd [#allocation3], 4294967280 }
  0xe7   :  { %105 = vsyncpa [#allocation3], 1 }

</bundles_post_ra>
